<compile_context>
chip_gen: v7x
topology: tpu7x:2x2x1
jax: 0.10.0
libtpu: 0.0.40
codegen_flags: <defaults>
</compile_context>

<pallas_src>
import functools

import jax
import jax.numpy as jnp
from jax import lax
from jax.experimental import pallas as pl
from jax.experimental.pallas import tpu as pltpu


# ----------------------------------------------------------------------------
# Pallas kernel: full LSTM recurrence (forward direction) + LayerNorm/MLP head
# ----------------------------------------------------------------------------
def lstm_head_kernel(x_ref,          # (T*Bp, F)  time-major, batch-padded, flat
                     wih_ref,        # (F, 4H)    i/f/o columns pre-scaled by 0.5
                     whhp_ref,       # (4H, 4H)   rows [0,H)=W_hh^T (scaled), rest 0
                     b_ref,          # (1, 4H)    (b_ih + b_hh), i/f/o pre-scaled
                     ga_ref,         # (1, 4H)    gate affine scale (0.5 i/f/o, 1 g)
                     gb_ref,         # (1, 4H)    gate affine shift (0.5 i/f/o, 0 g)
                     gamma_ref,      # (1, H)     LayerNorm weight
                     beta_ref,       # (1, H)     LayerNorm bias
                     w1_ref,         # (H, 16)
                     b1_ref,         # (1, 16)
                     w2_ref,         # (16, P)
                     b2_ref,         # (1, P)
                     out_ref,        # (Bp, P)
                     zx_ref,         # VMEM scratch (T*Bp, 4H)
                     *, T, Bp, H):
    H4 = 4 * H

    # ---- hoisted input projection + bias: ONE MXU call for all T steps ------
    zx_ref[...] = (jnp.dot(x_ref[...], wih_ref[...],
                           preferred_element_type=jnp.float32) + b_ref[...])

    # Loop-invariant recurrent RHS — read once, reused every step.
    whhp = whhp_ref[...]                                   # (4H, 4H)

    # Hoisted per-lane affine that converts tanh(z/2) into sigmoid(z) on the
    # i/f/o lane blocks (JAX doesn't CSE broadcast_in_dim — broadcast once).
    ga = jnp.broadcast_to(ga_ref[...], (Bp, H4))
    gb = jnp.broadcast_to(gb_ref[...], (Bp, H4))

    # h/c are lane-padded to 4H so every per-step op is a full-lane vreg op.
    # Only lanes [0, H) are meaningful; padded lanes carry bounded garbage and
    # are multiplied by the zero rows of whhp in the recurrent matmul
    # (invariant: whhp rows [H, 4H) must stay exactly zero).
    def step(t, carry):
        h_pad, c_pad = carry
        row = pl.multiple_of(t * Bp, Bp)
        z = zx_ref[pl.ds(row, Bp), :] + jnp.dot(
            h_pad, whhp, preferred_element_type=jnp.float32)      # (Bp, 4H)
        # One tanh per step: sigmoid on i/f/o lanes via hoisted affine,
        # plain tanh on the g lanes.
        g = ga * jnp.tanh(z) + gb
        # Align each gate block to lanes [0, H) with XLU rolls.
        i0 = g                                             # i already at [0, H)
        f0 = pltpu.roll(g, H4 - 1 * H, axis=1)             # f: [H, 2H)  -> [0, H)
        g0 = pltpu.roll(g, H4 - 2 * H, axis=1)             # g: [2H, 3H) -> [0, H)
        o0 = pltpu.roll(g, H4 - 3 * H, axis=1)             # o: [3H, 4H) -> [0, H)
        c_new = f0 * c_pad + i0 * g0                       # lanes [0, H) correct
        h_new = o0 * jnp.tanh(c_new)
        return h_new, c_new

    h0 = jnp.zeros((Bp, H4), jnp.float32)
    c0 = jnp.zeros((Bp, H4), jnp.float32)
    h_pad, _ = lax.fori_loop(0, T, step, (h0, c0), unroll=True)

    h_fin = h_pad[:, 0:H]                                  # == hn[0]  (Bp, H)

    # LayerNorm over the hidden dimension (eps = 1e-5, PyTorch default)
    mu = jnp.mean(h_fin, axis=-1, keepdims=True)
    var = jnp.mean((h_fin - mu) ** 2, axis=-1, keepdims=True)
    ln = (h_fin - mu) * lax.rsqrt(var + 1e-5) * gamma_ref[...] + beta_ref[...]

    # Linear(H,16) -> ReLU -> Linear(16,P) -> ReLU
    y1 = jnp.dot(ln, w1_ref[...], preferred_element_type=jnp.float32) + b1_ref[...]
    y1 = jnp.maximum(y1, 0.0)
    y2 = jnp.dot(y1, w2_ref[...], preferred_element_type=jnp.float32) + b2_ref[...]
    y2 = jnp.maximum(y2, 0.0)

    out_ref[...] = y2


# ----------------------------------------------------------------------------
# Wrapper
# ----------------------------------------------------------------------------
def my_lstm_forward(x, params):
    """x: (B, T, F) float32 -> (B, P) float32."""
    B, T, F = x.shape
    H = params["ln_gamma"].shape[1]
    P = params["w2_t"].shape[1]
    Bp = max(8, ((B + 7) // 8) * 8)          # pad batch to the 8-sublane granule

    # time-major, batch-padded, flattened to (T*Bp, F): the kernel's one-shot
    # input projection needs no in-kernel reshape and every per-step slice is
    # one aligned vreg.
    x_tm = jnp.transpose(x, (1, 0, 2))                       # (T, B, F)
    x_tm = jnp.pad(x_tm, ((0, 0), (0, Bp - B), (0, 0)))       # (T, Bp, F)
    x2d = x_tm.reshape(T * Bp, F)

    inputs = (
        x2d,
        params["k_wih"],                                  # (F, 4H)  pre-scaled
        params["k_whh_pad"],                              # (4H, 4H) pre-scaled
        params["k_b"],                                    # (1, 4H)  pre-scaled
        params["gate_a"],                                 # (1, 4H)
        params["gate_b"],                                 # (1, 4H)
        params["ln_gamma"],                               # (1, H)
        params["ln_beta"],                                # (1, H)
        params["w1_t"],                                   # (H, 16)
        params["b1"],                                     # (1, 16)
        params["w2_t"],                                   # (16, P)
        params["b2"],                                     # (1, P)
    )

    vmem = pl.BlockSpec(memory_space=pltpu.MemorySpace.VMEM)
    kernel = functools.partial(lstm_head_kernel, T=T, Bp=Bp, H=H)
    out = pl.pallas_call(
        kernel,
        out_shape=jax.ShapeDtypeStruct((Bp, P), jnp.float32),
        in_specs=[vmem] * len(inputs),
        out_specs=vmem,
        scratch_shapes=[pltpu.VMEM((T * Bp, 4 * H), jnp.float32)],
    )(*inputs)
    return out[:B]                                         # drop batch padding


# ----------------------------------------------------------------------------
# Deterministic parameter init (PyTorch-style uniform ranges)
# ----------------------------------------------------------------------------
def init_params(key, num_sensors, hidden_units, pred_len):
    F, H, P = num_sensors, hidden_units, pred_len
    ks = jax.random.split(key, 12)
    k_lstm = 1.0 / jnp.sqrt(H)

    def u(k, shape, bound):
        return jax.random.uniform(k, shape, jnp.float32, -bound, bound)

    # forward-direction LSTM weights (PyTorch shapes), then transpose for use
    w_ih = u(ks[0], (4 * H, F), k_lstm)
    w_hh = u(ks[1], (4 * H, H), k_lstm)
    b_ih = u(ks[2], (4 * H,), k_lstm)
    b_hh = u(ks[3], (4 * H,), k_lstm)
    # reverse-direction weights exist in the module but never affect hn[0]
    _w_ih_rev = u(ks[4], (4 * H, F), k_lstm)
    _w_hh_rev = u(ks[5], (4 * H, H), k_lstm)

    k1 = 1.0 / jnp.sqrt(H)
    w1 = u(ks[6], (16, H), k1)
    b1 = u(ks[7], (16,), k1)
    k2 = 1.0 / jnp.sqrt(16.0)
    w2 = u(ks[8], (P, 16), k2)
    b2 = u(ks[9], (P,), k2)

    wih_t = w_ih.T                                        # (F, 4H)
    whh_t = w_hh.T                                        # (H, 4H)
    b = (b_ih + b_hh).reshape(1, 4 * H)

    # sigmoid-via-tanh folding: sigmoid(x) = 0.5 + 0.5*tanh(x/2).  Pre-scale
    # the i/f/o gate columns of W_ih/W_hh/bias by 0.5; gate_a/gate_b is the
    # hoisted per-lane affine applied after the single in-kernel tanh.
    half = jnp.full((H,), 0.5, jnp.float32)
    one = jnp.ones((H,), jnp.float32)
    zero = jnp.zeros((H,), jnp.float32)
    col_scale = jnp.concatenate([half, half, one, half])       # (4H,)
    gate_a = col_scale.reshape(1, 4 * H)                       # 0.5 i/f/o, 1 g
    gate_b = jnp.concatenate([half, half, zero, half]).reshape(1, 4 * H)

    k_wih = wih_t * col_scale                                  # (F, 4H)
    k_whh_t = whh_t * col_scale                                # (H, 4H)
    k_whh_pad = jnp.zeros((4 * H, 4 * H), jnp.float32).at[:H, :].set(k_whh_t)
    k_b = b * col_scale                                        # (1, 4H)

    return {
        # unscaled (reference-check) params
        "wih_t": wih_t, "whh_t": whh_t, "b": b,
        # kernel params (pre-scaled for the single-tanh gate path)
        "k_wih": k_wih, "k_whh_pad": k_whh_pad, "k_b": k_b,
        "gate_a": gate_a, "gate_b": gate_b,
        # head
        "ln_gamma": jnp.ones((1, H), jnp.float32),
        "ln_beta": jnp.zeros((1, H), jnp.float32),
        "w1_t": w1.T, "b1": b1.reshape(1, 16),
        "w2_t": w2.T, "b2": b2.reshape(1, P),
    }


# ----------------------------------------------------------------------------
# Pure-JAX reference (for correctness check)
# ----------------------------------------------------------------------------
def reference_forward(x, params):
    B, T, F = x.shape
    H = params["whh_t"].shape[0]
    h = jnp.zeros((B, H), jnp.float32)
    c = jnp.zeros((B, H), jnp.float32)
    for t in range(T):
        z = x[:, t, :] @ params["wih_t"] + h @ params["whh_t"] + params["b"]
        i_g = jax.nn.sigmoid(z[:, 0 * H:1 * H])
        f_g = jax.nn.sigmoid(z[:, 1 * H:2 * H])
        g_g = jnp.tanh(z[:, 2 * H:3 * H])
        o_g = jax.nn.sigmoid(z[:, 3 * H:4 * H])
        c = f_g * c + i_g * g_g
        h = o_g * jnp.tanh(c)
    mu = jnp.mean(h, axis=-1, keepdims=True)
    var = jnp.mean((h - mu) ** 2, axis=-1, keepdims=True)
    ln = (h - mu) * lax.rsqrt(var + 1e-5) * params["ln_gamma"] + params["ln_beta"]
    y1 = jnp.maximum(ln @ params["w1_t"] + params["b1"], 0.0)
    y2 = jnp.maximum(y1 @ params["w2_t"] + params["b2"], 0.0)
    return y2


if __name__ == "__main__":
    num_sensors = 4
    hidden_units = 32       # 4*H == 128 -> gate blocks tile one full lane width
    pred_len = 8
    batch = 4
    seq_len = 8

    key = jax.random.PRNGKey(0)
    k_x, k_p = jax.random.split(key)
    x = jax.random.normal(k_x, (batch, seq_len, num_sensors), jnp.float32)
    params = init_params(k_p, num_sensors, hidden_units, pred_len)

    out = jax.block_until_ready(my_lstm_forward(x, params))
    ref = reference_forward(x, params)

    assert out.shape == (batch, pred_len)
    assert jnp.allclose(out, ref, atol=1e-4, rtol=1e-4), "mismatch vs reference"
    print("KERNEL_OK")
</pallas_src>

<mosaic_0001>
module attributes {stable_mosaic.version = 11 : i64} {
  func.func @lstm_head_kernel(%arg0: memref<64x4xf32, #tpu.memory_space<vmem>>, %arg1: memref<4x128xf32, #tpu.memory_space<vmem>>, %arg2: memref<128x128xf32, #tpu.memory_space<vmem>>, %arg3: memref<1x128xf32, #tpu.memory_space<vmem>>, %arg4: memref<1x128xf32, #tpu.memory_space<vmem>>, %arg5: memref<1x128xf32, #tpu.memory_space<vmem>>, %arg6: memref<1x32xf32, #tpu.memory_space<vmem>>, %arg7: memref<1x32xf32, #tpu.memory_space<vmem>>, %arg8: memref<32x16xf32, #tpu.memory_space<vmem>>, %arg9: memref<1x16xf32, #tpu.memory_space<vmem>>, %arg10: memref<16x8xf32, #tpu.memory_space<vmem>>, %arg11: memref<1x8xf32, #tpu.memory_space<vmem>>, %arg12: memref<8x8xf32, #tpu.memory_space<vmem>>, %arg13: memref<64x128xf32, #tpu.memory_space<vmem>>) attributes {dimension_semantics = [], scalar_prefetch = 0 : i64, scratch_operands = 1 : i64, tpu.core_type = #tpu.core_type<tc>} {
    %c0 = arith.constant 0 : index
    %c0_0 = arith.constant 0 : index
    %0 = vector.load %arg0[%c0, %c0_0] : memref<64x4xf32, #tpu.memory_space<vmem>>, vector<64x4xf32>
    %c0_1 = arith.constant 0 : index
    %c0_2 = arith.constant 0 : index
    %1 = vector.load %arg1[%c0_1, %c0_2] : memref<4x128xf32, #tpu.memory_space<vmem>>, vector<4x128xf32>
    %cst = arith.constant dense<0.000000e+00> : vector<64x128xf32>
    %2 = tpu.matmul %0, %1, %cst {dimension_numbers = #tpu.dot_dimension_numbers<[1], [0], [0], [1], [0, 0, 1, 1], [], []>} : vector<64x4xf32>, vector<4x128xf32>, vector<64x128xf32> -> vector<64x128xf32>
    %c0_3 = arith.constant 0 : index
    %c0_4 = arith.constant 0 : index
    %3 = vector.load %arg3[%c0_3, %c0_4] : memref<1x128xf32, #tpu.memory_space<vmem>>, vector<1x128xf32>
    %4 = vector.broadcast %3 : vector<1x128xf32> to vector<64x128xf32>
    %5 = arith.addf %2, %4 : vector<64x128xf32>
    %c0_5 = arith.constant 0 : index
    %c0_6 = arith.constant 0 : index
    %6 = vector.load %arg13[%c0_5, %c0_6] : memref<64x128xf32, #tpu.memory_space<vmem>>, vector<64x128xf32>
    tpu.vector_store %arg13[%c0_5, %c0_6], %5 {strides = array<i32>} : memref<64x128xf32, #tpu.memory_space<vmem>>, vector<64x128xf32>,
    %c0_7 = arith.constant 0 : index
    %c0_8 = arith.constant 0 : index
    %7 = vector.load %arg2[%c0_7, %c0_8] : memref<128x128xf32, #tpu.memory_space<vmem>>, vector<128x128xf32>
    %c0_9 = arith.constant 0 : index
    %c0_10 = arith.constant 0 : index
    %8 = vector.load %arg4[%c0_9, %c0_10] : memref<1x128xf32, #tpu.memory_space<vmem>>, vector<1x128xf32>
    %9 = vector.shape_cast %8 : vector<1x128xf32> to vector<1x128xf32>
    %10 = vector.broadcast %9 : vector<1x128xf32> to vector<8x128xf32>
    %c0_11 = arith.constant 0 : index
    %c0_12 = arith.constant 0 : index
    %11 = vector.load %arg5[%c0_11, %c0_12] : memref<1x128xf32, #tpu.memory_space<vmem>>, vector<1x128xf32>
    %12 = vector.shape_cast %11 : vector<1x128xf32> to vector<1x128xf32>
    %13 = vector.broadcast %12 : vector<1x128xf32> to vector<8x128xf32>
    %cst_13 = arith.constant 0.000000e+00 : f32
    %14 = vector.broadcast %cst_13 : f32 to vector<8x128xf32>
    %cst_14 = arith.constant 0.000000e+00 : f32
    %15 = vector.broadcast %cst_14 : f32 to vector<8x128xf32>
    %c0_i32 = arith.constant 0 : i32
    %c8_i32 = arith.constant 8 : i32
    %16 = arith.muli %c0_i32, %c8_i32 : i32
    %17 = tpu.assume_multiple %16, 8 : i32
    %18 = arith.index_cast %17 : i32 to index
    %c0_15 = arith.constant 0 : index
    %19 = vector.load %arg13[%18, %c0_15] : memref<64x128xf32, #tpu.memory_space<vmem>>, vector<8x128xf32>
    %cst_16 = arith.constant dense<0.000000e+00> : vector<8x128xf32>
    %20 = tpu.matmul %14, %7, %cst_16 {dimension_numbers = #tpu.dot_dimension_numbers<[1], [0], [0], [1], [0, 0, 1, 1], [], []>} : vector<8x128xf32>, vector<128x128xf32>, vector<8x128xf32> -> vector<8x128xf32>
    %21 = arith.addf %19, %20 : vector<8x128xf32>
    %22 = math.tanh %21 : vector<8x128xf32>
    %23 = arith.mulf %10, %22 : vector<8x128xf32>
    %24 = arith.addf %23, %13 : vector<8x128xf32>
    %c96_i32 = arith.constant 96 : i32
    %25 = tpu.dynamic_rotate %24 by %c96_i32 dim 1 : vector<8x128xf32>, i32 -> vector<8x128xf32>
    %c64_i32 = arith.constant 64 : i32
    %26 = tpu.dynamic_rotate %24 by %c64_i32 dim 1 : vector<8x128xf32>, i32 -> vector<8x128xf32>
    %c32_i32 = arith.constant 32 : i32
    %27 = tpu.dynamic_rotate %24 by %c32_i32 dim 1 : vector<8x128xf32>, i32 -> vector<8x128xf32>
    %28 = arith.mulf %25, %15 : vector<8x128xf32>
    %29 = arith.mulf %24, %26 : vector<8x128xf32>
    %30 = arith.addf %28, %29 : vector<8x128xf32>
    %31 = math.tanh %30 : vector<8x128xf32>
    %32 = arith.mulf %27, %31 : vector<8x128xf32>
    %c1_i32 = arith.constant 1 : i32
    %c8_i32_17 = arith.constant 8 : i32
    %33 = arith.muli %c1_i32, %c8_i32_17 : i32
    %34 = tpu.assume_multiple %33, 8 : i32
    %35 = arith.index_cast %34 : i32 to index
    %c0_18 = arith.constant 0 : index
    %36 = vector.load %arg13[%35, %c0_18] : memref<64x128xf32, #tpu.memory_space<vmem>>, vector<8x128xf32>
    %cst_19 = arith.constant dense<0.000000e+00> : vector<8x128xf32>
    %37 = tpu.matmul %32, %7, %cst_19 {dimension_numbers = #tpu.dot_dimension_numbers<[1], [0], [0], [1], [0, 0, 1, 1], [], []>} : vector<8x128xf32>, vector<128x128xf32>, vector<8x128xf32> -> vector<8x128xf32>
    %38 = arith.addf %36, %37 : vector<8x128xf32>
    %39 = math.tanh %38 : vector<8x128xf32>
    %40 = arith.mulf %10, %39 : vector<8x128xf32>
    %41 = arith.addf %40, %13 : vector<8x128xf32>
    %c96_i32_20 = arith.constant 96 : i32
    %42 = tpu.dynamic_rotate %41 by %c96_i32_20 dim 1 : vector<8x128xf32>, i32 -> vector<8x128xf32>
    %c64_i32_21 = arith.constant 64 : i32
    %43 = tpu.dynamic_rotate %41 by %c64_i32_21 dim 1 : vector<8x128xf32>, i32 -> vector<8x128xf32>
    %c32_i32_22 = arith.constant 32 : i32
    %44 = tpu.dynamic_rotate %41 by %c32_i32_22 dim 1 : vector<8x128xf32>, i32 -> vector<8x128xf32>
    %45 = arith.mulf %42, %30 : vector<8x128xf32>
    %46 = arith.mulf %41, %43 : vector<8x128xf32>
    %47 = arith.addf %45, %46 : vector<8x128xf32>
    %48 = math.tanh %47 : vector<8x128xf32>
    %49 = arith.mulf %44, %48 : vector<8x128xf32>
    %c2_i32 = arith.constant 2 : i32
    %c8_i32_23 = arith.constant 8 : i32
    %50 = arith.muli %c2_i32, %c8_i32_23 : i32
    %51 = tpu.assume_multiple %50, 8 : i32
    %52 = arith.index_cast %51 : i32 to index
    %c0_24 = arith.constant 0 : index
    %53 = vector.load %arg13[%52, %c0_24] : memref<64x128xf32, #tpu.memory_space<vmem>>, vector<8x128xf32>
    %cst_25 = arith.constant dense<0.000000e+00> : vector<8x128xf32>
    %54 = tpu.matmul %49, %7, %cst_25 {dimension_numbers = #tpu.dot_dimension_numbers<[1], [0], [0], [1], [0, 0, 1, 1], [], []>} : vector<8x128xf32>, vector<128x128xf32>, vector<8x128xf32> -> vector<8x128xf32>
    %55 = arith.addf %53, %54 : vector<8x128xf32>
    %56 = math.tanh %55 : vector<8x128xf32>
    %57 = arith.mulf %10, %56 : vector<8x128xf32>
    %58 = arith.addf %57, %13 : vector<8x128xf32>
    %c96_i32_26 = arith.constant 96 : i32
    %59 = tpu.dynamic_rotate %58 by %c96_i32_26 dim 1 : vector<8x128xf32>, i32 -> vector<8x128xf32>
    %c64_i32_27 = arith.constant 64 : i32
    %60 = tpu.dynamic_rotate %58 by %c64_i32_27 dim 1 : vector<8x128xf32>, i32 -> vector<8x128xf32>
    %c32_i32_28 = arith.constant 32 : i32
    %61 = tpu.dynamic_rotate %58 by %c32_i32_28 dim 1 : vector<8x128xf32>, i32 -> vector<8x128xf32>
    %62 = arith.mulf %59, %47 : vector<8x128xf32>
    %63 = arith.mulf %58, %60 : vector<8x128xf32>
    %64 = arith.addf %62, %63 : vector<8x128xf32>
    %65 = math.tanh %64 : vector<8x128xf32>
    %66 = arith.mulf %61, %65 : vector<8x128xf32>
    %c3_i32 = arith.constant 3 : i32
    %c8_i32_29 = arith.constant 8 : i32
    %67 = arith.muli %c3_i32, %c8_i32_29 : i32
    %68 = tpu.assume_multiple %67, 8 : i32
    %69 = arith.index_cast %68 : i32 to index
    %c0_30 = arith.constant 0 : index
    %70 = vector.load %arg13[%69, %c0_30] : memref<64x128xf32, #tpu.memory_space<vmem>>, vector<8x128xf32>
    %cst_31 = arith.constant dense<0.000000e+00> : vector<8x128xf32>
    %71 = tpu.matmul %66, %7, %cst_31 {dimension_numbers = #tpu.dot_dimension_numbers<[1], [0], [0], [1], [0, 0, 1, 1], [], []>} : vector<8x128xf32>, vector<128x128xf32>, vector<8x128xf32> -> vector<8x128xf32>
    %72 = arith.addf %70, %71 : vector<8x128xf32>
    %73 = math.tanh %72 : vector<8x128xf32>
    %74 = arith.mulf %10, %73 : vector<8x128xf32>
    %75 = arith.addf %74, %13 : vector<8x128xf32>
    %c96_i32_32 = arith.constant 96 : i32
    %76 = tpu.dynamic_rotate %75 by %c96_i32_32 dim 1 : vector<8x128xf32>, i32 -> vector<8x128xf32>
    %c64_i32_33 = arith.constant 64 : i32
    %77 = tpu.dynamic_rotate %75 by %c64_i32_33 dim 1 : vector<8x128xf32>, i32 -> vector<8x128xf32>
    %c32_i32_34 = arith.constant 32 : i32
    %78 = tpu.dynamic_rotate %75 by %c32_i32_34 dim 1 : vector<8x128xf32>, i32 -> vector<8x128xf32>
    %79 = arith.mulf %76, %64 : vector<8x128xf32>
    %80 = arith.mulf %75, %77 : vector<8x128xf32>
    %81 = arith.addf %79, %80 : vector<8x128xf32>
    %82 = math.tanh %81 : vector<8x128xf32>
    %83 = arith.mulf %78, %82 : vector<8x128xf32>
    %c4_i32 = arith.constant 4 : i32
    %c8_i32_35 = arith.constant 8 : i32
    %84 = arith.muli %c4_i32, %c8_i32_35 : i32
    %85 = tpu.assume_multiple %84, 8 : i32
    %86 = arith.index_cast %85 : i32 to index
    %c0_36 = arith.constant 0 : index
    %87 = vector.load %arg13[%86, %c0_36] : memref<64x128xf32, #tpu.memory_space<vmem>>, vector<8x128xf32>
    %cst_37 = arith.constant dense<0.000000e+00> : vector<8x128xf32>
    %88 = tpu.matmul %83, %7, %cst_37 {dimension_numbers = #tpu.dot_dimension_numbers<[1], [0], [0], [1], [0, 0, 1, 1], [], []>} : vector<8x128xf32>, vector<128x128xf32>, vector<8x128xf32> -> vector<8x128xf32>
    %89 = arith.addf %87, %88 : vector<8x128xf32>
    %90 = math.tanh %89 : vector<8x128xf32>
    %91 = arith.mulf %10, %90 : vector<8x128xf32>
    %92 = arith.addf %91, %13 : vector<8x128xf32>
    %c96_i32_38 = arith.constant 96 : i32
    %93 = tpu.dynamic_rotate %92 by %c96_i32_38 dim 1 : vector<8x128xf32>, i32 -> vector<8x128xf32>
    %c64_i32_39 = arith.constant 64 : i32
    %94 = tpu.dynamic_rotate %92 by %c64_i32_39 dim 1 : vector<8x128xf32>, i32 -> vector<8x128xf32>
    %c32_i32_40 = arith.constant 32 : i32
    %95 = tpu.dynamic_rotate %92 by %c32_i32_40 dim 1 : vector<8x128xf32>, i32 -> vector<8x128xf32>
    %96 = arith.mulf %93, %81 : vector<8x128xf32>
    %97 = arith.mulf %92, %94 : vector<8x128xf32>
    %98 = arith.addf %96, %97 : vector<8x128xf32>
    %99 = math.tanh %98 : vector<8x128xf32>
    %100 = arith.mulf %95, %99 : vector<8x128xf32>
    %c5_i32 = arith.constant 5 : i32
    %c8_i32_41 = arith.constant 8 : i32
    %101 = arith.muli %c5_i32, %c8_i32_41 : i32
    %102 = tpu.assume_multiple %101, 8 : i32
    %103 = arith.index_cast %102 : i32 to index
    %c0_42 = arith.constant 0 : index
    %104 = vector.load %arg13[%103, %c0_42] : memref<64x128xf32, #tpu.memory_space<vmem>>, vector<8x128xf32>
    %cst_43 = arith.constant dense<0.000000e+00> : vector<8x128xf32>
    %105 = tpu.matmul %100, %7, %cst_43 {dimension_numbers = #tpu.dot_dimension_numbers<[1], [0], [0], [1], [0, 0, 1, 1], [], []>} : vector<8x128xf32>, vector<128x128xf32>, vector<8x128xf32> -> vector<8x128xf32>
    %106 = arith.addf %104, %105 : vector<8x128xf32>
    %107 = math.tanh %106 : vector<8x128xf32>
    %108 = arith.mulf %10, %107 : vector<8x128xf32>
    %109 = arith.addf %108, %13 : vector<8x128xf32>
    %c96_i32_44 = arith.constant 96 : i32
    %110 = tpu.dynamic_rotate %109 by %c96_i32_44 dim 1 : vector<8x128xf32>, i32 -> vector<8x128xf32>
    %c64_i32_45 = arith.constant 64 : i32
    %111 = tpu.dynamic_rotate %109 by %c64_i32_45 dim 1 : vector<8x128xf32>, i32 -> vector<8x128xf32>
    %c32_i32_46 = arith.constant 32 : i32
    %112 = tpu.dynamic_rotate %109 by %c32_i32_46 dim 1 : vector<8x128xf32>, i32 -> vector<8x128xf32>
    %113 = arith.mulf %110, %98 : vector<8x128xf32>
    %114 = arith.mulf %109, %111 : vector<8x128xf32>
    %115 = arith.addf %113, %114 : vector<8x128xf32>
    %116 = math.tanh %115 : vector<8x128xf32>
    %117 = arith.mulf %112, %116 : vector<8x128xf32>
    %c6_i32 = arith.constant 6 : i32
    %c8_i32_47 = arith.constant 8 : i32
    %118 = arith.muli %c6_i32, %c8_i32_47 : i32
    %119 = tpu.assume_multiple %118, 8 : i32
    %120 = arith.index_cast %119 : i32 to index
    %c0_48 = arith.constant 0 : index
    %121 = vector.load %arg13[%120, %c0_48] : memref<64x128xf32, #tpu.memory_space<vmem>>, vector<8x128xf32>
    %cst_49 = arith.constant dense<0.000000e+00> : vector<8x128xf32>
    %122 = tpu.matmul %117, %7, %cst_49 {dimension_numbers = #tpu.dot_dimension_numbers<[1], [0], [0], [1], [0, 0, 1, 1], [], []>} : vector<8x128xf32>, vector<128x128xf32>, vector<8x128xf32> -> vector<8x128xf32>
    %123 = arith.addf %121, %122 : vector<8x128xf32>
    %124 = math.tanh %123 : vector<8x128xf32>
    %125 = arith.mulf %10, %124 : vector<8x128xf32>
    %126 = arith.addf %125, %13 : vector<8x128xf32>
    %c96_i32_50 = arith.constant 96 : i32
    %127 = tpu.dynamic_rotate %126 by %c96_i32_50 dim 1 : vector<8x128xf32>, i32 -> vector<8x128xf32>
    %c64_i32_51 = arith.constant 64 : i32
    %128 = tpu.dynamic_rotate %126 by %c64_i32_51 dim 1 : vector<8x128xf32>, i32 -> vector<8x128xf32>
    %c32_i32_52 = arith.constant 32 : i32
    %129 = tpu.dynamic_rotate %126 by %c32_i32_52 dim 1 : vector<8x128xf32>, i32 -> vector<8x128xf32>
    %130 = arith.mulf %127, %115 : vector<8x128xf32>
    %131 = arith.mulf %126, %128 : vector<8x128xf32>
    %132 = arith.addf %130, %131 : vector<8x128xf32>
    %133 = math.tanh %132 : vector<8x128xf32>
    %134 = arith.mulf %129, %133 : vector<8x128xf32>
    %c7_i32 = arith.constant 7 : i32
    %c8_i32_53 = arith.constant 8 : i32
    %135 = arith.muli %c7_i32, %c8_i32_53 : i32
    %136 = tpu.assume_multiple %135, 8 : i32
    %137 = arith.index_cast %136 : i32 to index
    %c0_54 = arith.constant 0 : index
    %138 = vector.load %arg13[%137, %c0_54] : memref<64x128xf32, #tpu.memory_space<vmem>>, vector<8x128xf32>
    %cst_55 = arith.constant dense<0.000000e+00> : vector<8x128xf32>
    %139 = tpu.matmul %134, %7, %cst_55 {dimension_numbers = #tpu.dot_dimension_numbers<[1], [0], [0], [1], [0, 0, 1, 1], [], []>} : vector<8x128xf32>, vector<128x128xf32>, vector<8x128xf32> -> vector<8x128xf32>
    %140 = arith.addf %138, %139 : vector<8x128xf32>
    %141 = math.tanh %140 : vector<8x128xf32>
    %142 = arith.mulf %10, %141 : vector<8x128xf32>
    %143 = arith.addf %142, %13 : vector<8x128xf32>
    %c96_i32_56 = arith.constant 96 : i32
    %144 = tpu.dynamic_rotate %143 by %c96_i32_56 dim 1 : vector<8x128xf32>, i32 -> vector<8x128xf32>
    %c64_i32_57 = arith.constant 64 : i32
    %145 = tpu.dynamic_rotate %143 by %c64_i32_57 dim 1 : vector<8x128xf32>, i32 -> vector<8x128xf32>
    %c32_i32_58 = arith.constant 32 : i32
    %146 = tpu.dynamic_rotate %143 by %c32_i32_58 dim 1 : vector<8x128xf32>, i32 -> vector<8x128xf32>
    %147 = arith.mulf %144, %132 : vector<8x128xf32>
    %148 = arith.mulf %143, %145 : vector<8x128xf32>
    %149 = arith.addf %147, %148 : vector<8x128xf32>
    %150 = math.tanh %149 : vector<8x128xf32>
    %151 = arith.mulf %146, %150 : vector<8x128xf32>
    %c8_i32_59 = arith.constant 8 : i32
    %152 = vector.extract_strided_slice %151 {offsets = [0, 0], sizes = [8, 32], strides = [1, 1]} : vector<8x128xf32> to vector<8x32xf32>
    %cst_60 = arith.constant dense<0.000000e+00> : vector<8xf32>
    %153 = vector.multi_reduction <add>, %152, %cst_60 [1] : vector<8x32xf32> to vector<8xf32>
    %154 = vector.shape_cast %153 : vector<8xf32> to vector<8x1xf32>
    %cst_61 = arith.constant 3.200000e+01 : f32
    %155 = vector.broadcast %cst_61 : f32 to vector<8x1xf32>
    %156 = arith.divf %154, %155 : vector<8x1xf32>
    %157 = vector.broadcast %156 : vector<8x1xf32> to vector<8x32xf32>
    %158 = arith.subf %152, %157 : vector<8x32xf32>
    %159 = arith.mulf %158, %158 : vector<8x32xf32>
    %cst_62 = arith.constant dense<0.000000e+00> : vector<8xf32>
    %160 = vector.multi_reduction <add>, %159, %cst_62 [1] : vector<8x32xf32> to vector<8xf32>
    %161 = vector.shape_cast %160 : vector<8xf32> to vector<8x1xf32>
    %cst_63 = arith.constant 3.200000e+01 : f32
    %162 = vector.broadcast %cst_63 : f32 to vector<8x1xf32>
    %163 = arith.divf %161, %162 : vector<8x1xf32>
    %164 = vector.broadcast %156 : vector<8x1xf32> to vector<8x32xf32>
    %165 = arith.subf %152, %164 : vector<8x32xf32>
    %cst_64 = arith.constant 9.99999974E-6 : f32
    %166 = vector.broadcast %cst_64 : f32 to vector<8x1xf32>
    %167 = arith.addf %163, %166 : vector<8x1xf32>
    %168 = math.rsqrt %167 : vector<8x1xf32>
    %169 = vector.broadcast %168 : vector<8x1xf32> to vector<8x32xf32>
    %170 = arith.mulf %165, %169 : vector<8x32xf32>
    %c0_65 = arith.constant 0 : index
    %c0_66 = arith.constant 0 : index
    %171 = vector.load %arg6[%c0_65, %c0_66] : memref<1x32xf32, #tpu.memory_space<vmem>>, vector<1x32xf32>
    %172 = vector.broadcast %171 : vector<1x32xf32> to vector<8x32xf32>
    %173 = arith.mulf %170, %172 : vector<8x32xf32>
    %c0_67 = arith.constant 0 : index
    %c0_68 = arith.constant 0 : index
    %174 = vector.load %arg7[%c0_67, %c0_68] : memref<1x32xf32, #tpu.memory_space<vmem>>, vector<1x32xf32>
    %175 = vector.broadcast %174 : vector<1x32xf32> to vector<8x32xf32>
    %176 = arith.addf %173, %175 : vector<8x32xf32>
    %c0_69 = arith.constant 0 : index
    %c0_70 = arith.constant 0 : index
    %177 = vector.load %arg8[%c0_69, %c0_70] : memref<32x16xf32, #tpu.memory_space<vmem>>, vector<32x16xf32>
    %cst_71 = arith.constant dense<0.000000e+00> : vector<8x16xf32>
    %178 = tpu.matmul %176, %177, %cst_71 {dimension_numbers = #tpu.dot_dimension_numbers<[1], [0], [0], [1], [0, 0, 1, 1], [], []>} : vector<8x32xf32>, vector<32x16xf32>, vector<8x16xf32> -> vector<8x16xf32>
    %c0_72 = arith.constant 0 : index
    %c0_73 = arith.constant 0 : index
    %179 = vector.load %arg9[%c0_72, %c0_73] : memref<1x16xf32, #tpu.memory_space<vmem>>, vector<1x16xf32>
    %180 = vector.broadcast %179 : vector<1x16xf32> to vector<8x16xf32>
    %181 = arith.addf %178, %180 : vector<8x16xf32>
    %cst_74 = arith.constant 0.000000e+00 : f32
    %182 = vector.broadcast %cst_74 : f32 to vector<8x16xf32>
    %183 = arith.maximumf %181, %182 : vector<8x16xf32>
    %c0_75 = arith.constant 0 : index
    %c0_76 = arith.constant 0 : index
    %184 = vector.load %arg10[%c0_75, %c0_76] : memref<16x8xf32, #tpu.memory_space<vmem>>, vector<16x8xf32>
    %cst_77 = arith.constant dense<0.000000e+00> : vector<8x8xf32>
    %185 = tpu.matmul %183, %184, %cst_77 {dimension_numbers = #tpu.dot_dimension_numbers<[1], [0], [0], [1], [0, 0, 1, 1], [], []>} : vector<8x16xf32>, vector<16x8xf32>, vector<8x8xf32> -> vector<8x8xf32>
    %c0_78 = arith.constant 0 : index
    %c0_79 = arith.constant 0 : index
    %186 = vector.load %arg11[%c0_78, %c0_79] : memref<1x8xf32, #tpu.memory_space<vmem>>, vector<1x8xf32>
    %187 = vector.broadcast %186 : vector<1x8xf32> to vector<8x8xf32>
    %188 = arith.addf %185, %187 : vector<8x8xf32>
    %cst_80 = arith.constant 0.000000e+00 : f32
    %189 = vector.broadcast %cst_80 : f32 to vector<8x8xf32>
    %190 = arith.maximumf %188, %189 : vector<8x8xf32>
    %c0_81 = arith.constant 0 : index
    %c0_82 = arith.constant 0 : index
    %191 = vector.load %arg12[%c0_81, %c0_82] : memref<8x8xf32, #tpu.memory_space<vmem>>, vector<8x8xf32>
    tpu.vector_store %arg12[%c0_81, %c0_82], %190 {strides = array<i32>} : memref<8x8xf32, #tpu.memory_space<vmem>>, vector<8x8xf32>,
    return
  }
}

</mosaic_0001>

<bundles_post_ra>
// kernel: tpu_custom_call.1
= control target key start
LH: loop header
LB: loop body
LE: loop exit
PB: predicated region body
PF: predicated region fallthrough
CT: control target
= control target key end

     0   :  { %17 = vsyncpa [#allocation4], 0  ;;  %s2387_s0 = inlined_call_operand.vmem [shape: f32[64,4], index: 0, kind: input, shape index: {}]   ;;  %s2388_s1 = inlined_call_operand.hbm [shape: f32[4,128], index: 1, kind: input, shape index: {}]   ;;  %s2389_s2 = inlined_call_operand.vmem [shape: f32[128,128], index: 2, kind: input, shape index: {}]   ;;  %s2390_s3 = inlined_call_operand.vmem [shape: f32[1,128], index: 3, kind: input, shape index: {}]   ;;  %s2391_s4 = inlined_call_operand.vmem [shape: f32[1,128], index: 4, kind: input, shape index: {}]   ;;  %s2392_s5 = inlined_call_operand.vmem [shape: f32[1,128], index: 5, kind: input, shape index: {}]   ;;  %s2393_s6 = inlined_call_operand.vmem [shape: f32[1,32], index: 6, kind: input, shape index: {}]   ;;  %s2394_s7 = inlined_call_operand.vmem [shape: f32[1,32], index: 7, kind: input, shape index: {}]   ;;  %s2395_s8 = inlined_call_operand.vmem [shape: f32[32,16], index: 8, kind: input, shape index: {}]   ;;  %s2396_s9 = inlined_call_operand.vmem [shape: f32[1,16], index: 9, kind: input, shape index: {}]   ;;  %s2397_s10 = inlined_call_operand.vmem [shape: f32[16,8], index: 10, kind: input, shape index: {}]   ;;  %s2398_s11 = inlined_call_operand.vmem [shape: f32[1,8], index: 11, kind: input, shape index: {}]   ;;  %s2399_s12 = inlined_call_operand.hbm [shape: f32[8,8], index: 12, kind: output, shape index: {}]  }
   0x1   :  { %18 = vsyncpa [#allocation5], 0  ;;  %s1928_s21 = smov [#allocation3]   ;;  %s1880_s25 = scalar_lea.hbm %s2388_s1, 64 }
   0x2   :  { %s27_s22 = sshll.u32 %s1928_s21, 4  ;;  %p1881_p0 = scmp.ne.s32.totalorder %s2388_s1, %s1880_s25  ;;  %s28_s22 = int_to_ptr.vmem [resolvable:$true] %s27_s22 }
   0x3   :  { %p1884_p1 = scmp.lt.u32.totalorder %s1880_s25, %s2388_s1 }
   0x5   :  { %p1886_p2 = pnand %p1884_p1, %p1881_p0 }
   0x7   :  { %1889 = shalt.err (!%p1886_p2)
}
   0x8   :  { %s1890_s30 = scalar_lea.vmem %s28_s22, 64  ;;  %p1895_p4 = scmp.lt.s32.totalorder %s28_s22, %s28_s22 }
   0x9   :  { %p1891_p3 = scmp.ne.s32.totalorder %s28_s22, %s1890_s30  ;;  %p1896_p5 = scmp.lt.s32.totalorder %s1890_s30, %s1890_s30 }
   0xb   :  { %p1897_p6 = por %p1896_p5, %p1895_p4 }
   0xd   :  { %p1898_p7 = pnand %p1897_p6, %p1891_p3 }
   0xf   :  { %1901 = shalt.err (!%p1898_p7)
}
  0x10   :  { %30 = dma.hbm_to_vmem [thread:$0]  %s2388_s1, 64, %s28_s22, [#allocation4]  }
  0x11   :  { %1924 = dma.done.wait [#allocation4], 64  }
  0x12   :  { %1925 = vsyncadd [#allocation4], 4294967232  ;;  %v1929_v0 = vmov 0.0|0.0   ;;  %vm1930_vm0 = vmmov 0   ;;  %v1931_v1 = vmov 0.0   ;;  %v212_v2 = vld [vmem:[%s2389_s2] sm:$0xff] }
  0x13   :  { %1637 = vmatprep.subr.bf16.mxu1 %v1929_v0  ;;  %1371 = vmatprep.mubr.msk.f32.mxu1 %vm1930_vm0, %v1931_v1  ;;  %v213_v3 = vld [vmem:[%s2389_s2 + $0x8] sm:$0xff]  ;;  %v214_v4 = vld [vmem:[%s2389_s2 + $0x10] sm:$0xff]  ;;  %v215_v6 = vld [vmem:[%s2389_s2 + $0x18] sm:$0xff]  ;;  %vm95_vm1 = vcmask 1043456   ;;  %vm70_vm2 = vcmask 31744   ;;  %s1933_s25 = smov 96  }
  0x14   :  { %v2025_v5 = vpack.c.bf16 %v213_v3, %v212_v2  ;;  %v2031_v7 = vpack.c.bf16 %v215_v6, %v214_v4  ;;  %v216_v8 = vld [vmem:[%s2389_s2 + $0x20] sm:$0xff]  ;;  %v217_v9 = vld [vmem:[%s2389_s2 + $0x28] sm:$0xff]  ;;  %v218_v14 = vld [vmem:[%s2389_s2 + $0x30] sm:$0xff]  ;;  %s1934_s28 = smov 64   ;;  %vm937_vm3 = vcmask 261120   ;;  %vm1062_vm4 = vcmask 130048  }
  0x15   :  { %v62_v10 = vld [vmem:[#allocation3] sm:$0xf]  ;;  %v55_v12 = vld [vmem:[%s2387_s0 + $0x8] sm:$0xff]  ;;  %v2048_v13 = vpack.c.bf16 %v217_v9, %v216_v8  ;;  %v219_v15 = vld [vmem:[%s2389_s2 + $0x38] sm:$0xff]  ;;  %s1935_s23 = smov [#allocation6]   ;;  %vm1137_vm5 = vcmask 64512  }
  0x16   :  { %1639 = vmatpush3.bf16.msra.mxu1 %v2025_v5  ;;  %1325 = vmatprep.subr.msk.mxu0 %vm95_vm1, %v62_v10  ;;  %v54_v11 = vld [vmem:[%s2387_s0] sm:$0xff]  ;;  %v2062_v16 = vpack.c.bf16 %v219_v15, %v218_v14  ;;  %v221_v18 = vld [vmem:[%s2389_s2 + $0x48] sm:$0xff]  ;;  %v222_v20 = vld [vmem:[%s2389_s2 + $0x50] sm:$0xff]  ;;  %s1145_s24 = sshll.u32 %s1935_s23, 4  ;;  %s1146_s24 = int_to_ptr.vmem [resolvable:$true] %s1145_s24 }
  0x17   :  { %1640 = vmatprep.subr.bf16.mxu1 %v1929_v0  ;;  %1326 = vmatpush3.msk.msra.mxu0 %vm95_vm1, %v62_v10  ;;  %v220_v17 = vld [vmem:[%s2389_s2 + $0x40] sm:$0xff]  ;;  %v223_v21 = vld [vmem:[%s2389_s2 + $0x58] sm:$0xff]  ;;  %v225_v24 = vld [vmem:[%s2389_s2 + $0x68] sm:$0xff]  ;;  %p1907_p9 = scmp.lt.s32.totalorder %s1146_s24, %s1146_s24 }
  0x18   :  { %1327 = vmatprep.mubr.msk.f32.mxu0 %vm70_vm2, %v54_v11  ;;  %1661 = vmatprep.subr.bf16.mxu0 %v1929_v0  ;;  %v2074_v19 = vpack.c.bf16 %v221_v18, %v220_v17  ;;  %v2086_v22 = vpack.c.bf16 %v223_v21, %v222_v20  ;;  %v224_v23 = vld [vmem:[%s2389_s2 + $0x60] sm:$0xff]  ;;  %v226_v26 = vld [vmem:[%s2389_s2 + $0x70] sm:$0xff]  ;;  %v227_v27 = vld [vmem:[%s2389_s2 + $0x78] sm:$0xff] }
  0x19   :  { %1328 = vmatmul.mubr.msk.f32.vlgmr.msra.gmra.mrb[0].mxu0 %vm70_vm2, %v55_v12  ;;  %v2098_v25 = vpack.c.bf16 %v225_v24, %v224_v23  ;;  %v2110_v28 = vpack.c.bf16 %v227_v27, %v226_v26  ;;  %v2145_v31 = vld [vmem:[%s2390_s3] ss:$0 sm:$0xff]  ;;  %v56_v37 = vld [vmem:[%s2387_s0 + $0x10] sm:$0xff]  ;;  %v57_v38 = vld [vmem:[%s2387_s0 + $0x18] sm:$0xff] }
  0x1a   :  { %1642 = vmatpush3.bf16.msra.mxu1 %v2031_v7  ;;  %1663 = vmatpush3.bf16.msra.mxu0 %v2025_v5  ;;  %v2151_v36 = vld [vmem:[%s2391_s4] ss:$0 sm:$0xff]  ;;  %v59_v43 = vld [vmem:[%s2387_s0 + $0x28] sm:$0xff]  ;;  %v60_v45 = vld [vmem:[%s2387_s0 + $0x30] sm:$0xff] }
  0x1b   :  { %1643 = vmatprep.subr.bf16.mxu1 %v1929_v0  ;;  %1664 = vmatprep.subr.bf16.mxu0 %v1929_v0  ;;  %v2163_v40 = vld [vmem:[%s2392_s5] ss:$0 sm:$0xff]  ;;  %s1932_s5 = smov 32   ;;  %v61_v46 = vld [vmem:[%s2387_s0 + $0x38] sm:$0xff] }
  0x1c   :  { %1330 = vmatprep.mubr.msk.f32.mxu0 %vm70_vm2, %v56_v37  ;;  %v58_v41 = vld [vmem:[%s2387_s0 + $0x20] sm:$0xff] }
  0x1d   :  { %1331 = vmatmul.mubr.msk.f32.gmra.mrb[2].mxu0 %vm70_vm2, %v57_v38 }
  0x1e   :  { %1645 = vmatpush3.bf16.msra.mxu1 %v2048_v13  ;;  %1666 = vmatpush3.bf16.msra.mxu0 %v2031_v7 }
  0x1f   :  { %1646 = vmatprep.subr.bf16.mxu1 %v1929_v0  ;;  %1667 = vmatprep.subr.bf16.mxu0 %v1929_v0 }
  0x20   :  { %1333 = vmatprep.mubr.msk.f32.mxu0 %vm70_vm2, %v58_v41 }
  0x21   :  { %1334 = vmatmul.mubr.msk.f32.gmra.mrb[4].mxu0 %vm70_vm2, %v59_v43 }
  0x22   :  { %1648 = vmatpush3.bf16.msra.mxu1 %v2062_v16  ;;  %1669 = vmatpush3.bf16.msra.mxu0 %v2048_v13 }
  0x23   :  { %1649 = vmatprep.subr.bf16.mxu1 %v1929_v0  ;;  %1670 = vmatprep.subr.bf16.mxu0 %v1929_v0 }
  0x24   :  { %1336 = vmatprep.mubr.msk.f32.mxu0 %vm70_vm2, %v60_v45 }
  0x25   :  { %1337 = vmatmul.mubr.msk.f32.gmra.mrb[6].mxu0 %vm70_vm2, %v61_v46 }
  0x26   :  { %1651 = vmatpush3.bf16.msra.mxu1 %v2074_v19  ;;  %1672 = vmatpush3.bf16.msra.mxu0 %v2062_v16 }
  0x27   :  { %1652 = vmatprep.subr.bf16.mxu1 %v1929_v0  ;;  %1673 = vmatprep.subr.bf16.mxu0 %v1929_v0 }
  0x28   :  { %1406 = vmatprep.mubr.msk.f32.mxu0 %vm1930_vm0, %v1931_v1 }
  0x2a   :  { %1654 = vmatpush3.bf16.msra.mxu1 %v2086_v22  ;;  %1675 = vmatpush3.bf16.msra.mxu0 %v2074_v19 }
  0x2b   :  { %1655 = vmatprep.subr.bf16.mxu1 %v1929_v0  ;;  %1676 = vmatprep.subr.bf16.mxu0 %v1929_v0 }
  0x2e   :  { %1657 = vmatpush3.bf16.msra.mxu1 %v2098_v25  ;;  %1678 = vmatpush3.bf16.msra.mxu0 %v2086_v22 }
  0x2f   :  { %1658 = vmatprep.subr.bf16.mxu1 %v1929_v0  ;;  %1679 = vmatprep.subr.bf16.mxu0 %v1929_v0 }
  0x32   :  { %1660 = vmatpush3.bf16.msra.mxu1 %v2110_v28  ;;  %1681 = vmatpush3.bf16.msra.mxu0 %v2098_v25 }
  0x33   :  { %1685 = vmatprep.subr.bf16.mxu1 %v1929_v0  ;;  %1682 = vmatprep.subr.bf16.mxu0 %v1929_v0 }
  0x35   :  { %1372 = vmatmul.mubr.f32.vlgmr.msra.gmra.mrb[0].mxu1 %v1931_v1 }
  0x36   :  { %1687 = vmatpush3.bf16.msra.mxu1 %v2025_v5  ;;  %1441 = vmatprep.mubr.msk.f32.mxu1 %vm1930_vm0, %v1931_v1 }
  0x37   :  { %1688 = vmatprep.subr.bf16.mxu1 %v1929_v0  ;;  %1684 = vmatpush3.bf16.msra.mxu0 %v2110_v28 }
  0x38   :  { %1709 = vmatprep.subr.bf16.mxu0 %v1929_v0 }
  0x3a   :  { %1690 = vmatpush3.bf16.msra.mxu1 %v2031_v7 }
  0x3b   :  { %1691 = vmatprep.subr.bf16.mxu1 %v1929_v0 }
  0x3e   :  { %1693 = vmatpush3.bf16.msra.mxu1 %v2048_v13 }
  0x3f   :  { %1694 = vmatprep.subr.bf16.mxu1 %v1929_v0 }
  0x42   :  { %1696 = vmatpush3.bf16.msra.mxu1 %v2062_v16 }
  0x43   :  { %1697 = vmatprep.subr.bf16.mxu1 %v1929_v0 }
  0x46   :  { %1699 = vmatpush3.bf16.msra.mxu1 %v2074_v19 }
  0x47   :  { %1700 = vmatprep.subr.bf16.mxu1 %v1929_v0 }
  0x4a   :  { %1702 = vmatpush3.bf16.msra.mxu1 %v2086_v22 }
  0x4b   :  { %1703 = vmatprep.subr.bf16.mxu1 %v1929_v0 }
  0x4e   :  { %1705 = vmatpush3.bf16.msra.mxu1 %v2098_v25 }
  0x4f   :  { %1706 = vmatprep.subr.bf16.mxu1 %v1929_v0 }
  0x52   :  { %1708 = vmatpush3.bf16.msra.mxu1 %v2110_v28 }
  0x53   :  { %1733 = vmatprep.subr.bf16.mxu1 %v1929_v0 }
  0xec   :  { %v2140_v29 = vpop.f32.mrb[0].mxu0 }
  0xed   :  { %v165_v30 = vpop.f32.mrb[1].mxu0  ;;  %v171_v61 = vadd.f32 %v2140_v29, %v2145_v31 }
  0xee   :  { %v166_v32 = vadd.f32 %v2145_v31, %v165_v30 }
  0xf0   :  { %v2207_v55 = vpop.f32.mrb[2].mxu0 }
  0xf1   :  { %v175_v56 = vpop.f32.mrb[3].mxu0 }
  0xf2   :  { %v176_v18 = vadd.f32 %v2145_v31, %v175_v56 }
  0xf4   :  { %v2209_v57 = vpop.f32.mrb[4].mxu0 }
  0xf5   :  { %v2211_v58 = vpop.f32.mrb[5].mxu0 }
  0xf8   :  { %v2213_v59 = vpop.f32.mrb[6].mxu0 }
  0xf9   :  { %v2215_v60 = vpop.f32.mrb[7].mxu0 }
 0x108   :  { %v309_v33 = vpop.f32.mrb[0].mxu1 }
 0x109   :  { %v313_v34 = vadd.f32 %v309_v33, %v166_v32  ;;  %v1373_v35 = vpop.f32.mrb[1].mxu1 }
 0x10b   :  { %1846 = vtanh.f32 %v313_v34 }
 0x115   :  { %v1847_v39 = vpop.eup %1846 }
 0x116   :  { %v315_v42 = vmul.f32 %v1847_v39, %v2151_v36  ;;  %v181_v39 = vadd.f32 %v2207_v55, %v2145_v31  ;;  %v186_v55 = vadd.f32 %v2145_v31, %v2211_v58 }
 0x118   :  { %v316_v44 = vadd.f32 %v2163_v40, %v315_v42 }
 0x11a   :  { %321 = vrot.lane.b32.xlu1 %v316_v44, %s1932_s5  ;;  %317 = vrot.lane.b32.xlu0 %v316_v44, %s1933_s25 }
 0x11e   :  { %319 = vrot.lane.b32.xlu0 %v316_v44, %s1934_s28 }
 0x18c   :  { %v318_v47 = vpop.permute.xlu0 %317  ;;  %v322_v53 = vpop.permute.xlu1 %321 }
 0x18d   :  { %v323_v49 = vmul.f32 0.0, %v318_v47 }
 0x190   :  { %v320_v48 = vpop.permute.xlu0 %319 }
 0x191   :  { %v324_v50 = vmul.f32 %v320_v48, %v316_v44 }
 0x193   :  { %v325_v51 = vadd.f32 %v324_v50, %v323_v49 }
 0x195   :  { %1848 = vtanh.f32 %v325_v51 }
 0x19f   :  { %v1849_v52 = vpop.eup %1848 }
 0x1a0   :  { %v327_v54 = vmul.f32 %v1849_v52, %v322_v53 }
 0x1a2   :  { %1407 = vmatmul.mubr.f32.vlgmr.msra.gmra.mrb[8].mxu0 %v327_v54 }
 0x1a3   :  { %1711 = vmatpush3.bf16.msra.mxu0 %v2025_v5  ;;  %1476 = vmatprep.mubr.msk.f32.mxu0 %vm1930_vm0, %v1931_v1 }
 0x1a4   :  { %1712 = vmatprep.subr.bf16.mxu0 %v1929_v0 }
 0x1a7   :  { %1714 = vmatpush3.bf16.msra.mxu0 %v2031_v7 }
 0x1a8   :  { %1715 = vmatprep.subr.bf16.mxu0 %v1929_v0 }
 0x1ab   :  { %1717 = vmatpush3.bf16.msra.mxu0 %v2048_v13 }
 0x1ac   :  { %1718 = vmatprep.subr.bf16.mxu0 %v1929_v0 }
 0x1af   :  { %1720 = vmatpush3.bf16.msra.mxu0 %v2062_v16 }
 0x1b0   :  { %1721 = vmatprep.subr.bf16.mxu0 %v1929_v0 }
 0x1b3   :  { %1723 = vmatpush3.bf16.msra.mxu0 %v2074_v19 }
 0x1b4   :  { %1724 = vmatprep.subr.bf16.mxu0 %v1929_v0 }
 0x1b7   :  { %1726 = vmatpush3.bf16.msra.mxu0 %v2086_v22 }
 0x1b8   :  { %1727 = vmatprep.subr.bf16.mxu0 %v1929_v0 }
 0x1bb   :  { %1729 = vmatpush3.bf16.msra.mxu0 %v2098_v25 }
 0x1bc   :  { %1730 = vmatprep.subr.bf16.mxu0 %v1929_v0 }
 0x1bf   :  { %1732 = vmatpush3.bf16.msra.mxu0 %v2110_v28 }
 0x1c0   :  { %1757 = vmatprep.subr.bf16.mxu0 %v1929_v0 }
 0x275   :  { %v396_v62 = vpop.f32.mrb[8].mxu0 }
 0x276   :  { %v400_v63 = vadd.f32 %v396_v62, %v171_v61  ;;  %v1408_v2 = vpop.f32.mrb[9].mxu0 }
 0x278   :  { %1850 = vtanh.f32 %v400_v63 }
 0x282   :  { %v1851_v3 = vpop.eup %1850 }
 0x283   :  { %v402_v4 = vmul.f32 %v1851_v3, %v2151_v36 }
 0x285   :  { %v403_v6 = vadd.f32 %v2163_v40, %v402_v4 }
 0x287   :  { %406 = vrot.lane.b32.xlu0 %v403_v6, %s1934_s28  ;;  %404 = vrot.lane.b32.xlu1 %v403_v6, %s1933_s25 }
 0x28b   :  { %408 = vrot.lane.b32.xlu1 %v403_v6, %s1932_s5 }
 0x2f9   :  { %v407_v8 = vpop.permute.xlu0 %406  ;;  %v405_v9 = vpop.permute.xlu1 %404 }
 0x2fa   :  { %v411_v10 = vmul.f32 %v407_v8, %v403_v6  ;;  %v410_v11 = vmul.f32 %v405_v9, %v325_v51 }
 0x2fc   :  { %v412_v12 = vadd.f32 %v411_v10, %v410_v11 }
 0x2fd   :  { %v409_v15 = vpop.permute.xlu1 %408 }
 0x2fe   :  { %1852 = vtanh.f32 %v412_v12 }
 0x308   :  { %v1853_v14 = vpop.eup %1852 }
 0x309   :  { %v414_v17 = vmul.f32 %v1853_v14, %v409_v15 }
 0x30b   :  { %1442 = vmatmul.mubr.f32.vlgmr.msra.gmra.mrb[2].mxu1 %v414_v17 }
 0x30c   :  { %1735 = vmatpush3.bf16.msra.mxu1 %v2025_v5  ;;  %1511 = vmatprep.mubr.msk.f32.mxu1 %vm1930_vm0, %v1931_v1 }
 0x30d   :  { %1736 = vmatprep.subr.bf16.mxu1 %v1929_v0 }
 0x310   :  { %1738 = vmatpush3.bf16.msra.mxu1 %v2031_v7 }
 0x311   :  { %1739 = vmatprep.subr.bf16.mxu1 %v1929_v0 }
 0x314   :  { %1741 = vmatpush3.bf16.msra.mxu1 %v2048_v13 }
 0x315   :  { %1742 = vmatprep.subr.bf16.mxu1 %v1929_v0 }
 0x318   :  { %1744 = vmatpush3.bf16.msra.mxu1 %v2062_v16 }
 0x319   :  { %1745 = vmatprep.subr.bf16.mxu1 %v1929_v0 }
 0x31c   :  { %1747 = vmatpush3.bf16.msra.mxu1 %v2074_v19 }
 0x31d   :  { %1748 = vmatprep.subr.bf16.mxu1 %v1929_v0 }
 0x320   :  { %1750 = vmatpush3.bf16.msra.mxu1 %v2086_v22 }
 0x321   :  { %1751 = vmatprep.subr.bf16.mxu1 %v1929_v0 }
 0x324   :  { %1753 = vmatpush3.bf16.msra.mxu1 %v2098_v25 }
 0x325   :  { %1754 = vmatprep.subr.bf16.mxu1 %v1929_v0 }
 0x328   :  { %1756 = vmatpush3.bf16.msra.mxu1 %v2110_v28 }
 0x329   :  { %1781 = vmatprep.subr.bf16.mxu1 %v1929_v0 }
 0x3de   :  { %v483_v20 = vpop.f32.mrb[2].mxu1 }
 0x3df   :  { %v487_v21 = vadd.f32 %v483_v20, %v176_v18  ;;  %v1443_v23 = vpop.f32.mrb[3].mxu1 }
 0x3e0   :  { %v196_v23 = vadd.f32 %v2145_v31, %v2215_v60 }
 0x3e1   :  { %1854 = vtanh.f32 %v487_v21 }
 0x3eb   :  { %v1855_v24 = vpop.eup %1854 }
 0x3ec   :  { %v489_v26 = vmul.f32 %v1855_v24, %v2151_v36 }
 0x3ee   :  { %v490_v27 = vadd.f32 %v2163_v40, %v489_v26 }
 0x3f0   :  { %493 = vrot.lane.b32.xlu1 %v490_v27, %s1934_s28  ;;  %491 = vrot.lane.b32.xlu0 %v490_v27, %s1933_s25 }
 0x3f4   :  { %495 = vrot.lane.b32.xlu0 %v490_v27, %s1932_s5 }
 0x462   :  { %v494_v29 = vpop.permute.xlu1 %493  ;;  %v492_v30 = vpop.permute.xlu0 %491 }
 0x463   :  { %v498_v32 = vmul.f32 %v494_v29, %v490_v27  ;;  %v497_v33 = vmul.f32 %v492_v30, %v412_v12 }
 0x465   :  { %v499_v34 = vadd.f32 %v498_v32, %v497_v33 }
 0x466   :  { %v496_v37 = vpop.permute.xlu0 %495 }
 0x467   :  { %1856 = vtanh.f32 %v499_v34 }
 0x471   :  { %v1857_v35 = vpop.eup %1856 }
 0x472   :  { %v501_v38 = vmul.f32 %v1857_v35, %v496_v37 }
 0x474   :  { %1477 = vmatmul.mubr.f32.vlgmr.msra.gmra.mrb[10].mxu0 %v501_v38 }
 0x475   :  { %1759 = vmatpush3.bf16.msra.mxu0 %v2025_v5  ;;  %1546 = vmatprep.mubr.msk.f32.mxu0 %vm1930_vm0, %v1931_v1 }
 0x476   :  { %1760 = vmatprep.subr.bf16.mxu0 %v1929_v0 }
 0x479   :  { %1762 = vmatpush3.bf16.msra.mxu0 %v2031_v7 }
 0x47a   :  { %1763 = vmatprep.subr.bf16.mxu0 %v1929_v0 }
 0x47d   :  { %1765 = vmatpush3.bf16.msra.mxu0 %v2048_v13 }
 0x47e   :  { %1766 = vmatprep.subr.bf16.mxu0 %v1929_v0 }
 0x481   :  { %1768 = vmatpush3.bf16.msra.mxu0 %v2062_v16 }
 0x482   :  { %1769 = vmatprep.subr.bf16.mxu0 %v1929_v0 }
 0x485   :  { %1771 = vmatpush3.bf16.msra.mxu0 %v2074_v19 }
 0x486   :  { %1772 = vmatprep.subr.bf16.mxu0 %v1929_v0 }
 0x489   :  { %1774 = vmatpush3.bf16.msra.mxu0 %v2086_v22 }
 0x48a   :  { %1775 = vmatprep.subr.bf16.mxu0 %v1929_v0 }
 0x48d   :  { %1777 = vmatpush3.bf16.msra.mxu0 %v2098_v25 }
 0x48e   :  { %1778 = vmatprep.subr.bf16.mxu0 %v1929_v0 }
 0x491   :  { %1780 = vmatpush3.bf16.msra.mxu0 %v2110_v28 }
 0x492   :  { %1805 = vmatprep.subr.bf16.mxu0 %v1929_v0 }
 0x547   :  { %v570_v41 = vpop.f32.mrb[10].mxu0 }
 0x548   :  { %v574_v42 = vadd.f32 %v570_v41, %v181_v39  ;;  %v1478_v43 = vpop.f32.mrb[11].mxu0 }
 0x54a   :  { %1858 = vtanh.f32 %v574_v42  ;;  %v201_v42 = vadd.f32 %v2213_v59, %v2145_v31 }
 0x554   :  { %v1859_v44 = vpop.eup %1858 }
 0x555   :  { %v576_v45 = vmul.f32 %v1859_v44, %v2151_v36 }
 0x557   :  { %v577_v46 = vadd.f32 %v2163_v40, %v576_v45 }
 0x559   :  { %580 = vrot.lane.b32.xlu0 %v577_v46, %s1934_s28  ;;  %578 = vrot.lane.b32.xlu1 %v577_v46, %s1933_s25 }
 0x55d   :  { %582 = vrot.lane.b32.xlu1 %v577_v46, %s1932_s5 }
 0x5cb   :  { %v581_v47 = vpop.permute.xlu0 %580  ;;  %v579_v48 = vpop.permute.xlu1 %578 }
 0x5cc   :  { %v585_v49 = vmul.f32 %v581_v47, %v577_v46  ;;  %v584_v50 = vmul.f32 %v579_v48, %v499_v34 }
 0x5ce   :  { %v586_v51 = vadd.f32 %v585_v49, %v584_v50 }
 0x5cf   :  { %v583_v53 = vpop.permute.xlu1 %582 }
 0x5d0   :  { %1860 = vtanh.f32 %v586_v51 }
 0x5da   :  { %v1861_v52 = vpop.eup %1860 }
 0x5db   :  { %v588_v54 = vmul.f32 %v1861_v52, %v583_v53 }
 0x5dd   :  { %1512 = vmatmul.mubr.f32.vlgmr.msra.gmra.mrb[4].mxu1 %v588_v54 }
 0x5de   :  { %1783 = vmatpush3.bf16.msra.mxu1 %v2025_v5  ;;  %1581 = vmatprep.mubr.msk.f32.mxu1 %vm1930_vm0, %v1931_v1 }
 0x5df   :  { %1784 = vmatprep.subr.bf16.mxu1 %v1929_v0 }
 0x5e2   :  { %1786 = vmatpush3.bf16.msra.mxu1 %v2031_v7 }
 0x5e3   :  { %1787 = vmatprep.subr.bf16.mxu1 %v1929_v0 }
 0x5e6   :  { %1789 = vmatpush3.bf16.msra.mxu1 %v2048_v13 }
 0x5e7   :  { %1790 = vmatprep.subr.bf16.mxu1 %v1929_v0 }
 0x5ea   :  { %1792 = vmatpush3.bf16.msra.mxu1 %v2062_v16 }
 0x5eb   :  { %1793 = vmatprep.subr.bf16.mxu1 %v1929_v0 }
 0x5ee   :  { %1795 = vmatpush3.bf16.msra.mxu1 %v2074_v19 }
 0x5ef   :  { %1796 = vmatprep.subr.bf16.mxu1 %v1929_v0 }
 0x5f2   :  { %1798 = vmatpush3.bf16.msra.mxu1 %v2086_v22 }
 0x5f3   :  { %1799 = vmatprep.subr.bf16.mxu1 %v1929_v0 }
 0x5f6   :  { %1801 = vmatpush3.bf16.msra.mxu1 %v2098_v25 }
 0x5f7   :  { %1802 = vmatprep.subr.bf16.mxu1 %v1929_v0 }
 0x5fa   :  { %1804 = vmatpush3.bf16.msra.mxu1 %v2110_v28 }
 0x5fb   :  { %1829 = vmatprep.subr.bf16.mxu1 %v1929_v0 }
 0x6b0   :  { %v657_v56 = vpop.f32.mrb[4].mxu1 }
 0x6b1   :  { %v661_v61 = vadd.f32 %v657_v56, %v186_v55  ;;  %v1513_v62 = vpop.f32.mrb[5].mxu1 }
 0x6b2   :  { %v968_v62 = vld [vmem:[%s2395_s8] sm:$0xff] }
 0x6b3   :  { %1862 = vtanh.f32 %v661_v61 }
 0x6bd   :  { %v1863_v63 = vpop.eup %1862 }
 0x6be   :  { %v663_v2 = vmul.f32 %v1863_v63, %v2151_v36  ;;  %v969_v63 = vld [vmem:[%s2395_s8 + $0x8] sm:$0xff] }
 0x6c0   :  { %v664_v3 = vadd.f32 %v2163_v40, %v663_v2  ;;  %v1830_v2 = vpack.c.bf16 %v969_v63, %v968_v62 }
 0x6c2   :  { %667 = vrot.lane.b32.xlu1 %v664_v3, %s1934_s28  ;;  %665 = vrot.lane.b32.xlu0 %v664_v3, %s1933_s25 }
 0x6c6   :  { %669 = vrot.lane.b32.xlu0 %v664_v3, %s1932_s5 }
 0x734   :  { %v668_v4 = vpop.permute.xlu1 %667  ;;  %v666_v6 = vpop.permute.xlu0 %665 }
 0x735   :  { %v672_v8 = vmul.f32 %v668_v4, %v664_v3  ;;  %v671_v9 = vmul.f32 %v666_v6, %v586_v51  ;;  %v970_v3 = vld [vmem:[%s2395_s8 + $0x10] sm:$0xff]  ;;  %v971_v4 = vld [vmem:[%s2395_s8 + $0x18] sm:$0xff] }
 0x736   :  { %v1833_v6 = vpack.c.bf16 %v971_v4, %v970_v3 }
 0x737   :  { %v673_v58 = vadd.f32 %v672_v8, %v671_v9 }
 0x738   :  { %v670_v11 = vpop.permute.xlu0 %669 }
 0x739   :  { %1864 = vtanh.f32 %v673_v58 }
 0x743   :  { %v1865_v10 = vpop.eup %1864 }
 0x744   :  { %v675_v12 = vmul.f32 %v1865_v10, %v670_v11  ;;  %v1166_v11 = vld [vmem:[%s2393_s6] ss:$0 sm:$0xff] }
 0x746   :  { %1547 = vmatmul.mubr.f32.vlgmr.msra.gmra.mrb[12].mxu0 %v675_v12  ;;  %v1167_v12 = vld [vmem:[%s2394_s7] ss:$0 sm:$0xff] }
 0x747   :  { %1807 = vmatpush3.bf16.msra.mxu0 %v2025_v5  ;;  %1616 = vmatprep.mubr.msk.f32.mxu0 %vm1930_vm0, %v1931_v1  ;;  %v191_v5 = vadd.f32 %v2209_v57, %v2145_v31 }
 0x748   :  { %1808 = vmatprep.subr.bf16.mxu0 %v1929_v0 }
 0x74b   :  { %1810 = vmatpush3.bf16.msra.mxu0 %v2031_v7 }
 0x74c   :  { %1811 = vmatprep.subr.bf16.mxu0 %v1929_v0 }
 0x74f   :  { %1813 = vmatpush3.bf16.msra.mxu0 %v2048_v13 }
 0x750   :  { %1814 = vmatprep.subr.bf16.mxu0 %v1929_v0 }
 0x753   :  { %1816 = vmatpush3.bf16.msra.mxu0 %v2062_v16 }
 0x754   :  { %1817 = vmatprep.subr.bf16.mxu0 %v1929_v0 }
 0x757   :  { %1819 = vmatpush3.bf16.msra.mxu0 %v2074_v19 }
 0x758   :  { %1820 = vmatprep.subr.bf16.mxu0 %v1929_v0 }
 0x75b   :  { %1822 = vmatpush3.bf16.msra.mxu0 %v2086_v22 }
 0x75c   :  { %1823 = vmatprep.subr.bf16.mxu0 %v1929_v0 }
 0x75f   :  { %1825 = vmatpush3.bf16.msra.mxu0 %v2098_v25 }
 0x760   :  { %1826 = vmatprep.subr.bf16.mxu0 %v1929_v0 }
 0x763   :  { %1828 = vmatpush3.bf16.msra.mxu0 %v2110_v28 }
 0x764   :  { %1835 = vmatprep.subr.bf16.mxu0 %v1929_v0 }
 0x819   :  { %v744_v7 = vpop.f32.mrb[12].mxu0 }
 0x81a   :  { %v748_v13 = vadd.f32 %v744_v7, %v191_v5  ;;  %v1548_v16 = vpop.f32.mrb[13].mxu0 }
 0x81b   :  { %v1054_v16 = vld [vmem:[%s2397_s10 + $0x8] sm:$0xff] }
 0x81c   :  { %1866 = vtanh.f32 %v748_v13  ;;  %v1053_v13 = vld [vmem:[%s2397_s10] sm:$0xff] }
 0x826   :  { %v1867_v19 = vpop.eup %1866 }
 0x827   :  { %v750_v22 = vmul.f32 %v1867_v19, %v2151_v36  ;;  %v1836_v19 = vpack.c.bf16 %v1054_v16, %v1053_v13 }
 0x829   :  { %v751_v14 = vadd.f32 %v2163_v40, %v750_v22  ;;  %v1168_v22 = vld [vmem:[%s2396_s9] ss:$0 sm:$0xff]  ;;  %s1902_s9 = scalar_lea.vmem %s1146_s24, 128 }
 0x82a   :  { %p1903_p8 = scmp.ne.s32.totalorder %s1146_s24, %s1902_s9  ;;  %p1908_p10 = scmp.lt.s32.totalorder %s1902_s9, %s1902_s9 }
 0x82b   :  { %754 = vrot.lane.b32.xlu0 %v751_v14, %s1934_s28  ;;  %752 = vrot.lane.b32.xlu1 %v751_v14, %s1933_s25 }
 0x82c   :  { %p1909_p11 = por %p1908_p10, %p1907_p9 }
 0x82e   :  { %p1910_p12 = pnand %p1909_p11, %p1903_p8 }
 0x82f   :  { %756 = vrot.lane.b32.xlu1 %v751_v14, %s1932_s5 }
 0x89d   :  { %v755_v25 = vpop.permute.xlu0 %754  ;;  %v753_v28 = vpop.permute.xlu1 %752 }
 0x89e   :  { %v759_v15 = vmul.f32 %v755_v25, %v751_v14  ;;  %v758_v17 = vmul.f32 %v753_v28, %v673_v58 }
 0x8a0   :  { %v760_v57 = vadd.f32 %v759_v15, %v758_v17  ;;  %v1170_v17 = vld [vmem:[%s2398_s11] ss:$0 sm:$0xff] }
 0x8a1   :  { %v757_v20 = vpop.permute.xlu1 %756 }
 0x8a2   :  { %1868 = vtanh.f32 %v760_v57 }
 0x8ac   :  { %v1869_v18 = vpop.eup %1868 }
 0x8ad   :  { %v762_v21 = vmul.f32 %v1869_v18, %v757_v20 }
 0x8af   :  { %1582 = vmatmul.mubr.f32.vlgmr.msra.gmra.mrb[6].mxu1 %v762_v21 }
 0x8b0   :  { %1627 = vmatprep.mubr.msk.f32.mxu1 %vm1930_vm0, %v1931_v1  ;;  %1831 = vmatpush3.bf16.msra.mxu1 %v1830_v2 }
 0x8b1   :  { %1832 = vmatprep.subr.bf16.mxu1 %v1929_v0 }
 0x8b4   :  { %1834 = vmatpush3.bf16.msra.mxu1 %v1833_v6 }
 0x982   :  { %v831_v24 = vpop.f32.mrb[6].mxu1 }
 0x983   :  { %v835_v26 = vadd.f32 %v831_v24, %v196_v23  ;;  %v1583_v27 = vpop.f32.mrb[7].mxu1 }
 0x985   :  { %1870 = vtanh.f32 %v835_v26 }
 0x98f   :  { %v1871_v29 = vpop.eup %1870 }
 0x990   :  { %v837_v30 = vmul.f32 %v1871_v29, %v2151_v36 }
 0x992   :  { %v838_v32 = vadd.f32 %v2163_v40, %v837_v30 }
 0x994   :  { %841 = vrot.lane.b32.xlu1 %v838_v32, %s1934_s28  ;;  %839 = vrot.lane.b32.xlu0 %v838_v32, %s1933_s25 }
 0x998   :  { %843 = vrot.lane.b32.xlu0 %v838_v32, %s1932_s5 }
 0xa06   :  { %v842_v33 = vpop.permute.xlu1 %841  ;;  %v840_v34 = vpop.permute.xlu0 %839 }
 0xa07   :  { %v846_v35 = vmul.f32 %v842_v33, %v838_v32  ;;  %v845_v37 = vmul.f32 %v840_v34, %v760_v57 }
 0xa09   :  { %v847_v60 = vadd.f32 %v846_v35, %v845_v37 }
 0xa0a   :  { %v844_v39 = vpop.permute.xlu0 %843 }
 0xa0b   :  { %1872 = vtanh.f32 %v847_v60 }
 0xa15   :  { %v1873_v38 = vpop.eup %1872 }
 0xa16   :  { %v849_v41 = vmul.f32 %v1873_v38, %v844_v39 }
 0xa18   :  { %1617 = vmatmul.mubr.f32.vlgmr.msra.gmra.mrb[14].mxu0 %v849_v41 }
 0xa19   :  { %1634 = vmatprep.mubr.msk.f32.mxu0 %vm1930_vm0, %v1931_v1  ;;  %1837 = vmatpush3.bf16.msra.mxu0 %v1836_v19 }
 0xaeb   :  { %v918_v43 = vpop.f32.mrb[14].mxu0 }
 0xaec   :  { %v922_v44 = vadd.f32 %v918_v43, %v201_v42  ;;  %v1618_v45 = vpop.f32.mrb[15].mxu0 }
 0xaee   :  { %1874 = vtanh.f32 %v922_v44 }
 0xaf8   :  { %v1875_v46 = vpop.eup %1874 }
 0xaf9   :  { %v924_v47 = vmul.f32 %v1875_v46, %v2151_v36 }
 0xafb   :  { %v925_v48 = vadd.f32 %v2163_v40, %v924_v47 }
 0xafd   :  { %928 = vrot.lane.b32.xlu0 %v925_v48, %s1934_s28  ;;  %926 = vrot.lane.b32.xlu1 %v925_v48, %s1933_s25 }
 0xb01   :  { %930 = vrot.lane.b32.xlu1 %v925_v48, %s1932_s5 }
 0xb6f   :  { %v929_v49 = vpop.permute.xlu0 %928  ;;  %v927_v1 = vpop.permute.xlu1 %926 }
 0xb70   :  { %v933_v50 = vmul.f32 %v929_v49, %v925_v48  ;;  %v932_v51 = vmul.f32 %v927_v1, %v847_v60 }
 0xb72   :  { %v934_v31 = vadd.f32 %v933_v50, %v932_v51 }
 0xb73   :  { %v931_v52 = vpop.permute.xlu1 %930 }
 0xb74   :  { %1876 = vtanh.f32 %v934_v31 }
 0xb7e   :  { %v1877_v59 = vpop.eup %1876 }
 0xb7f   :  { %v936_v53 = vmul.f32 %v1877_v59, %v931_v52 }
 0xb81   :  { %v938_v36 = vsel %vm937_vm3, %v936_v53, 0.0 }
 0xb82   :  { %939 = vadd.xlane.f32.xlu0 %v938_v36 }
 0xc0f   :  { %v940_v40 = vpop.xlane.xlu0 %939 }
 0xc10   :  { %v942_v54 = vmul.f32 0.03125, %v940_v40 }
 0xc12   :  { %v943_v55 = vsub.f32 %v936_v53, %v942_v54 }
 0xc14   :  { %v944_v56 = vmul.f32 %v943_v55, %v943_v55 }
 0xc16   :  { %v945_v61 = vsel %vm937_vm3, %v944_v56, 0.0 }
 0xc17   :  { %946 = vadd.xlane.f32.xlu1 %v945_v61 }
 0xca4   :  { %v947_v8 = vpop.xlane.xlu1 %946 }
 0xca5   :  { %v948_v9 = vmul.f32 0.03125, %v947_v8 }
 0xca7   :  { %v949_v58 = vadd.f32 1e-05, %v948_v9 }
 0xca9   :  { %1878 = vrsqrt.f32 %v949_v58 }
 0xcb3   :  { %v1879_v10 = vpop.eup %1878 }
 0xcb4   :  { %v951_v0 = vmul.f32 %v1879_v10, %v943_v55 }
 0xcb6   :  { %v959_v5 = vmul.f32 %v1166_v11, %v951_v0 }
 0xcb8   :  { %v967_v7 = vadd.f32 %v1167_v12, %v959_v5 }
 0xcba   :  { %1628 = vmatmul.mubr.msk.f32.vlgmr.msra.gmra.mrb[8].mxu1 %vm937_vm3, %v967_v7 }
 0xd8d   :  { %v1048_v14 = vpop.f32.mrb[8].mxu1 }
 0xd8e   :  { %v1049_v25 = vadd.f32 %v1168_v22, %v1048_v14  ;;  %v1629_v28 = vpop.f32.mrb[9].mxu1 }
 0xd90   :  { %v1052_v15 = vmax.f32 %v1049_v25, 0.0 }
 0xd92   :  { %1635 = vmatmul.mubr.msk.f32.vlgmr.msra.gmra.mrb[16].mxu0 %vm1062_vm4, %v1052_v15 }
 0xe65   :  { %v1132_v57 = vpop.f32.mrb[16].mxu0 }
 0xe66   :  { %v1133_v18 = vadd.f32 %v1170_v17, %v1132_v57  ;;  %v1636_v20 = vpop.f32.mrb[17].mxu0 }
 0xe68   :  { %v1136_v21 = vmax.f32 %v1133_v18, 0.0 }
 0xe6a   :  { %1138 = vst.msk [vmem:[#allocation6] sm:$0xff] %vm1137_vm5, %v1136_v21 }
 0xe6b   :  { %1913 = shalt.err (!%p1910_p12)
}
 0xe6c   :  { %s1914_s11 = scalar_lea.hbm %s2399_s12, 128 }
 0xe6d   :  { %p1915_p13 = scmp.ne.s32.totalorder %s2399_s12, %s1914_s11  ;;  %p1918_p0 = scmp.lt.u32.totalorder %s1914_s11, %s2399_s12 }
 0xe6f   :  { %p1920_p1 = pnand %p1918_p0, %p1915_p13 }
 0xe71   :  { %1923 = shalt.err (!%p1920_p1)
}
 0xe72   :  { %1148 = dma.vmem_to_hbm [thread:$0]  %s1146_s24, 128, %s2399_s12, [#allocation5]  }
 0xe73   :  { %1926 = dma.done.wait [#allocation5], 128  }
 0xe74   :  { %1927 = vsyncadd [#allocation5], 4294967168 }
 0xe75   :  { %1152 = vsyncpa [#allocation4], 1 }
 0xe76   :  { %1153 = vsyncpa [#allocation5], 1 }

</bundles_post_ra>
